<compile_context>
chip_gen: v7x
topology: tpu7x:2x2x1
jax: 0.10.0
libtpu: 0.0.40
codegen_flags: <defaults>
</compile_context>

<pallas_src>
import functools
import math

import jax
import jax.numpy as jnp
from jax import lax
from jax.experimental import pallas as pl
from jax.experimental.pallas import tpu as pltpu


def _round_up(x, m):
    return (x + m - 1) // m * m


def _cdiv(a, b):
    return -(-a // b)


def _masked_bce_kernel(pred_ref, targ_ref, mask_ref, counts_ref, bnd_ref,
                       num_out_ref, den_out_ref,
                       num_acc, den_acc, carry_ref,
                       *, event_weight, seq_len, tiles_per_part):
    p = pl.program_id(0)
    s = pl.program_id(1)
    ns = pl.num_programs(1)

    counts = counts_ref[...]                       # (Cf, B, ts), int32 or f32
    cf, _, ts = counts.shape

    @pl.when(s == 0)
    def _init():
        num_acc[...] = jnp.zeros_like(num_acc)
        den_acc[...] = jnp.zeros_like(den_acc)
        # "Previous frame" for this partition's first column (frame 0 is its
        # own previous frame; later partitions get the true preceding column).
        carry_ref[...] = bnd_ref[...]

    pred = pred_ref[...].astype(jnp.float32)       # (B, ts)
    targ = targ_ref[...].astype(jnp.float32)
    msk = mask_ref[...].astype(jnp.float32)

    # In-kernel ragged-tail handling: columns at/after seq_len (overhang of a
    # partial tile, or a phantom clamped tile) are neutralised so garbage
    # loads can never poison the sums (NaN * 0 == NaN).
    col = ((p * tiles_per_part + s) * ts
           + lax.broadcasted_iota(jnp.int32, pred.shape, 1))
    valid = col < seq_len
    msk = jnp.where(valid, msk, 0.0)
    targ = jnp.where(valid, targ, 0.0)
    pred = jnp.where(valid, pred, 0.5)

    # nn.BCELoss(reduction='none') with its -100 clamp on each log term.
    log_p = jnp.maximum(jnp.log(pred), -100.0)
    log_1mp = jnp.maximum(jnp.log(1.0 - pred), -100.0)
    losses = -(targ * log_p + (1.0 - targ) * log_1mp)

    # prev[..., j] = counts[..., j-1]; column 0 comes from the carried
    # boundary column (previous tile / previous partition / frame 0 itself).
    rolled = pltpu.roll(counts, shift=1, axis=2)             # XLU lane rotate
    lane = lax.broadcasted_iota(jnp.int32, counts.shape, 2)
    prev = jnp.where(lane == 0,
                     jnp.broadcast_to(carry_ref[...], counts.shape), rolled)
    changed = counts != prev                                 # (Cf, B, ts)
    ev = changed[0]
    for c in range(1, cf):                                   # whole-slab ORs
        ev = jnp.logical_or(ev, changed[c])
    weights = 1.0 + ev.astype(jnp.float32) * (event_weight - 1.0)

    wm = weights * msk
    num_tile = losses * wm

    # Fold the tile into fixed-width accumulators with aligned lane-slab adds
    # (accumulator VMEM does not scale with the tile width).
    fw = num_acc.shape[1]
    num_fold = num_tile[:, 0:fw]
    den_fold = wm[:, 0:fw]
    for k in range(1, ts // fw):
        num_fold = num_fold + num_tile[:, k * fw:(k + 1) * fw]
        den_fold = den_fold + wm[:, k * fw:(k + 1) * fw]
    num_acc[...] += num_fold
    den_acc[...] += den_fold

    # Carry this tile's last column as the next tile's "previous frame".
    carry_ref[...] = counts[:, :, ts - 1:ts]

    @pl.when(s == ns - 1)
    def _finalize():
        num_out_ref[...] = jnp.broadcast_to(jnp.sum(num_acc[...]),
                                            num_out_ref.shape)
        den_out_ref[...] = jnp.broadcast_to(jnp.sum(den_acc[...]),
                                            den_out_ref.shape)


def masked_bce_loss(predictions, targets, mask, player_counts=None,
                    event_weight=3.0, pack_counts=True, seq_tile=None):
    """Masked, event-weighted BCE loss (forward pass) on TPU via Pallas.

    predictions/targets/mask: (B, S).  player_counts: (B, S, C) or None.
    pack_counts=True assumes non-negative integer counts < 256 and C <= 4
    (the module's player-count domain); otherwise a general f32 path is used.
    seq_tile optionally caps the sequence tile width (testing / tuning).
    """
    B, S = predictions.shape

    # ---- player-counts stream (dominant HBM term) ---------------------------
    if player_counts is None:
        counts = jnp.zeros((1, B, S), jnp.int32)           # no events anywhere
    else:
        C = player_counts.shape[-1]
        if pack_counts and C <= 4:
            # Bit-pack the C count features into one int32 per (b, s).
            pc = player_counts.astype(jnp.int32)            # (B, S, C)
            shifts = 8 * jnp.arange(C, dtype=jnp.int32)
            counts = jnp.sum(pc << shifts, axis=-1).astype(jnp.int32)[None]
        else:
            # General fallback: feature-major (C, B, S), exact for any floats.
            counts = jnp.transpose(player_counts.astype(jnp.float32),
                                   (2, 0, 1))
    cf = counts.shape[0]

    pb = jnp.dtype(predictions.dtype).itemsize
    tb = jnp.dtype(targets.dtype).itemsize
    mb = jnp.dtype(mask.dtype).itemsize
    cb = jnp.dtype(counts.dtype).itemsize

    # ---- sequence tiling -----------------------------------------------------
    bytes_per_col = B * (pb + tb + mb) + cf * B * cb
    b_pad = _round_up(B, 8)                                  # sublane padding
    padded_per_col = 2 * b_pad * (pb + tb + mb + cf * cb)    # double-buffered
    target_step_bytes = 4 << 20       # amortise ~0.35us per-grid-step overhead
    vmem_budget = 40 << 20            # stay inside v7x's 64 MiB physical VMEM

    s128 = _round_up(S, 128)
    if S <= 128:
        ts = S                                               # one exact tile
    else:
        ts = (target_step_bytes // bytes_per_col) // 128 * 128
        ts_cap = (vmem_budget // padded_per_col) // 128 * 128
        ts = max(128, min(ts, ts_cap, s128))
        if seq_tile is not None:
            ts = max(128, min(ts, _round_up(int(seq_tile), 128)))

    tiles_total = _cdiv(S, ts)
    if (tiles_total == 1 and S > 256 and ts % 128 == 0
            and S * bytes_per_col >= (2 << 20)):
        # Big single-tile problem: split so both v7x TensorCores get work.
        ts = _round_up(_cdiv(S, 2), 128)
        tiles_total = _cdiv(S, ts)

    npart = 2 if tiles_total >= 2 else 1
    tiles_per_part = _cdiv(tiles_total, npart)
    last_tile = tiles_total - 1

    if ts % 128 == 0:
        nchunks = math.gcd(ts // 128, 16)
    else:
        nchunks = 1
    fold_w = ts // nchunks

    # Per-partition "previous frame" column for the carry initialisation.
    starts = [0] + [p * tiles_per_part * ts - 1 for p in range(1, npart)]
    boundary = jnp.concatenate([counts[:, :, s0:s0 + 1] for s0 in starts],
                               axis=0)                       # (npart*cf, B, 1)

    kernel = functools.partial(_masked_bce_kernel,
                               event_weight=float(event_weight),
                               seq_len=S, tiles_per_part=tiles_per_part)

    def col2(pi, si):
        # Clamp phantom trailing tiles back onto the last real tile; their
        # contribution is zeroed in-kernel by the column-index mask.
        return (0, jnp.minimum(pi * tiles_per_part + si, last_tile))

    def col3(pi, si):
        return (0, 0, jnp.minimum(pi * tiles_per_part + si, last_tile))

    est_vmem = (ts * padded_per_col + 2 * b_pad * fold_w * 4
                + 2 * npart * cf * b_pad * cb + 4 * npart * 8 * 128 * 4)
    vmem_limit = int(min(56 << 20, max(32 << 20, est_vmem * 5 // 4)))

    cost = pl.CostEstimate(
        flops=int(14 * B * S + 4 * cf * B * S),
        transcendentals=int(2 * B * S),
        bytes_accessed=int(B * S * (pb + tb + mb) + cf * B * S * cb
                           + 2 * npart * 8 * 128 * 4))

    num_out, den_out = pl.pallas_call(
        kernel,
        out_shape=(jax.ShapeDtypeStruct((npart, 8, 128), jnp.float32),
                   jax.ShapeDtypeStruct((npart, 8, 128), jnp.float32)),
        grid=(npart, tiles_per_part),
        in_specs=[
            pl.BlockSpec((B, ts), col2),                     # predictions
            pl.BlockSpec((B, ts), col2),                     # targets
            pl.BlockSpec((B, ts), col2),                     # mask
            pl.BlockSpec((cf, B, ts), col3),                 # counts
            pl.BlockSpec((cf, B, 1), lambda pi, si: (pi, 0, 0)),   # boundary
        ],
        out_specs=[
            pl.BlockSpec((1, 8, 128), lambda pi, si: (pi, 0, 0)),  # num partial
            pl.BlockSpec((1, 8, 128), lambda pi, si: (pi, 0, 0)),  # den partial
        ],
        scratch_shapes=[
            pltpu.VMEM((B, fold_w), jnp.float32),            # numerator acc
            pltpu.VMEM((B, fold_w), jnp.float32),            # denominator acc
            pltpu.VMEM((cf, B, 1), counts.dtype),            # carried column
        ],
        compiler_params=pltpu.CompilerParams(
            dimension_semantics=("parallel", "arbitrary"),
            vmem_limit_bytes=vmem_limit),
        cost_estimate=cost,
    )(predictions, targets, mask, counts, boundary)

    # Tiny cross-partition reduction + divide (den == 0, i.e. a fully masked
    # batch, yields NaN exactly like the reference).
    # TODO(synk): small-B sublane underfill (B < 8) still pads vregs; padding B
    # upstream would add a wrapper pass, so it is left to the caller.
    return num_out[:, 0, 0].sum() / den_out[:, 0, 0].sum()


def _reference(predictions, targets, mask, player_counts, event_weight=3.0):
    log_p = jnp.maximum(jnp.log(predictions), -100.0)
    log_1mp = jnp.maximum(jnp.log(1.0 - predictions), -100.0)
    losses = -(targets * log_p + (1.0 - targets) * log_1mp)
    weights = jnp.ones_like(losses)
    if player_counts is not None:
        prev = jnp.concatenate([player_counts[:, :1], player_counts[:, :-1]],
                               axis=1)
        changes = jnp.abs(player_counts - prev).sum(axis=2)
        weights = weights + (changes > 0).astype(jnp.float32) * (event_weight - 1.0)
    return (losses * weights * mask).sum() / (weights * mask).sum()


if __name__ == "__main__":
    # Case 1: small single-tile shapes (B=2, S=8, C=4), packed-counts path.
    B, S, C = 2, 8, 4
    k1, k2, k3, k4 = jax.random.split(jax.random.PRNGKey(0), 4)
    predictions = jax.nn.sigmoid(jax.random.normal(k1, (B, S), jnp.float32))
    targets = jax.random.bernoulli(k2, 0.5, (B, S)).astype(jnp.float32)
    mask = jnp.ones((B, S), jnp.float32).at[1, 6:].set(0.0)
    player_counts = jax.random.randint(k4, (B, S, C), 0, 3).astype(jnp.float32)

    loss = jax.block_until_ready(
        masked_bce_loss(predictions, targets, mask, player_counts, 3.0))
    ref = _reference(predictions, targets, mask, player_counts, 3.0)
    assert jnp.allclose(loss, ref, rtol=1e-5, atol=1e-5), (loss, ref)

    # Case 2: multi-tile, two partitions (packed counts), ragged tail +
    # phantom-tile clamping + cross-tile / cross-partition prev-count carries.
    B2, S2, C2 = 2, 300, 4
    j1, j2, j3, j4 = jax.random.split(jax.random.PRNGKey(1), 4)
    predictions2 = jax.nn.sigmoid(jax.random.normal(j1, (B2, S2), jnp.float32))
    targets2 = jax.random.bernoulli(j2, 0.5, (B2, S2)).astype(jnp.float32)
    mask2 = jnp.ones((B2, S2), jnp.float32).at[0, 250:].set(0.0)
    player_counts2 = jax.random.randint(j4, (B2, S2, C2), 0, 3).astype(jnp.float32)

    loss2 = jax.block_until_ready(
        masked_bce_loss(predictions2, targets2, mask2, player_counts2, 3.0,
                        seq_tile=128))
    ref2 = _reference(predictions2, targets2, mask2, player_counts2, 3.0)
    assert jnp.allclose(loss2, ref2, rtol=1e-5, atol=1e-5), (loss2, ref2)

    # Case 2b: general float fallback path (feature-major counts), single
    # 384-wide tile with an in-kernel-masked overhang.
    loss2b = jax.block_until_ready(
        masked_bce_loss(predictions2, targets2, mask2, player_counts2, 3.0,
                        pack_counts=False))
    assert jnp.allclose(loss2b, ref2, rtol=1e-5, atol=1e-5), (loss2b, ref2)

    # Case 3: player_counts=None path (all-ones weights).
    loss3 = jax.block_until_ready(
        masked_bce_loss(predictions, targets, mask, None, 3.0))
    ref3 = _reference(predictions, targets, mask, None, 3.0)
    assert jnp.allclose(loss3, ref3, rtol=1e-5, atol=1e-5), (loss3, ref3)

    print("KERNEL_OK")
</pallas_src>

<mosaic_0001>
module attributes {stable_mosaic.version = 11 : i64} {
  func.func @_masked_bce_kernel(%arg0: i32, %arg1: i32, %arg2: memref<2x8xf32, #tpu.memory_space<vmem>>, %arg3: memref<2x8xf32, #tpu.memory_space<vmem>>, %arg4: memref<2x8xf32, #tpu.memory_space<vmem>>, %arg5: memref<1x2x8xi32, #tpu.memory_space<vmem>>, %arg6: memref<1x2x1xi32, #tpu.memory_space<vmem>>, %arg7: memref<1x8x128xf32, #tpu.memory_space<vmem>>, %arg8: memref<1x8x128xf32, #tpu.memory_space<vmem>>, %arg9: memref<2x8xf32, #tpu.memory_space<vmem>>, %arg10: memref<2x8xf32, #tpu.memory_space<vmem>>, %arg11: memref<1x2x1xi32, #tpu.memory_space<vmem>>) attributes {dimension_semantics = [#tpu.dimension_semantics<parallel>, #tpu.dimension_semantics<arbitrary>], iteration_bounds = array<i64: 1, 1>, scalar_prefetch = 0 : i64, scratch_operands = 3 : i64, tpu.core_type = #tpu.core_type<tc>, window_params = [{transform_indices = @transform_0, window_bounds = array<i64: 2, 8>}, {transform_indices = @transform_1, window_bounds = array<i64: 2, 8>}, {transform_indices = @transform_2, window_bounds = array<i64: 2, 8>}, {transform_indices = @transform_3, window_bounds = array<i64: 1, 2, 8>}, {transform_indices = @transform_4, window_bounds = array<i64: 1, 2, 1>}, {transform_indices = @transform_5, window_bounds = array<i64: 1, 8, 128>}, {transform_indices = @transform_6, window_bounds = array<i64: 1, 8, 128>}]} {
    %c0 = arith.constant 0 : index
    %c0_0 = arith.constant 0 : index
    %c0_1 = arith.constant 0 : index
    %0 = vector.load %arg5[%c0, %c0_0, %c0_1] : memref<1x2x8xi32, #tpu.memory_space<vmem>>, vector<1x2x8xi32>
    %c0_i32 = arith.constant 0 : i32
    %1 = arith.cmpi eq, %arg1, %c0_i32 : i32
    %2 = arith.extui %1 : i1 to i32
    %c0_i32_2 = arith.constant 0 : i32
    %3 = arith.cmpi ne, %2, %c0_i32_2 : i32
    scf.if %3 {
      %cst_37 = arith.constant 0.000000e+00 : f32
      %65 = vector.broadcast %cst_37 : f32 to vector<2x8xf32>
      %c0_38 = arith.constant 0 : index
      %c0_39 = arith.constant 0 : index
      %66 = vector.load %arg9[%c0_38, %c0_39] : memref<2x8xf32, #tpu.memory_space<vmem>>, vector<2x8xf32>
      tpu.vector_store %arg9[%c0_38, %c0_39], %65 {strides = array<i32>} : memref<2x8xf32, #tpu.memory_space<vmem>>, vector<2x8xf32>,
      %cst_40 = arith.constant 0.000000e+00 : f32
      %67 = vector.broadcast %cst_40 : f32 to vector<2x8xf32>
      %c0_41 = arith.constant 0 : index
      %c0_42 = arith.constant 0 : index
      %68 = vector.load %arg10[%c0_41, %c0_42] : memref<2x8xf32, #tpu.memory_space<vmem>>, vector<2x8xf32>
      tpu.vector_store %arg10[%c0_41, %c0_42], %67 {strides = array<i32>} : memref<2x8xf32, #tpu.memory_space<vmem>>, vector<2x8xf32>,
      %c0_43 = arith.constant 0 : index
      %c0_44 = arith.constant 0 : index
      %c0_45 = arith.constant 0 : index
      %69 = vector.load %arg6[%c0_43, %c0_44, %c0_45] : memref<1x2x1xi32, #tpu.memory_space<vmem>>, vector<1x2x1xi32>
      %c0_46 = arith.constant 0 : index
      %c0_47 = arith.constant 0 : index
      %c0_48 = arith.constant 0 : index
      %70 = vector.load %arg11[%c0_46, %c0_47, %c0_48] : memref<1x2x1xi32, #tpu.memory_space<vmem>>, vector<1x2x1xi32>
      tpu.vector_store %arg11[%c0_46, %c0_47, %c0_48], %69 {strides = array<i32>} : memref<1x2x1xi32, #tpu.memory_space<vmem>>, vector<1x2x1xi32>,
    } else {
    }
    %c0_3 = arith.constant 0 : index
    %c0_4 = arith.constant 0 : index
    %4 = vector.load %arg2[%c0_3, %c0_4] : memref<2x8xf32, #tpu.memory_space<vmem>>, vector<2x8xf32>
    %c0_5 = arith.constant 0 : index
    %c0_6 = arith.constant 0 : index
    %5 = vector.load %arg3[%c0_5, %c0_6] : memref<2x8xf32, #tpu.memory_space<vmem>>, vector<2x8xf32>
    %c0_7 = arith.constant 0 : index
    %c0_8 = arith.constant 0 : index
    %6 = vector.load %arg4[%c0_7, %c0_8] : memref<2x8xf32, #tpu.memory_space<vmem>>, vector<2x8xf32>
    %c1_i32 = arith.constant 1 : i32
    %7 = arith.muli %arg0, %c1_i32 : i32
    %8 = arith.addi %7, %arg1 : i32
    %c8_i32 = arith.constant 8 : i32
    %9 = arith.muli %8, %c8_i32 : i32
    %10 = tpu.iota {dimensions = array<i32: 1>} : vector<2x8xi32>
    %11 = vector.broadcast %9 : i32 to vector<2x8xi32>
    %12 = arith.addi %11, %10 : vector<2x8xi32>
    %c8_i32_9 = arith.constant 8 : i32
    %13 = vector.broadcast %c8_i32_9 : i32 to vector<2x8xi32>
    %14 = arith.cmpi slt, %12, %13 : vector<2x8xi32>
    %cst = arith.constant 0.000000e+00 : f32
    %15 = vector.broadcast %cst : f32 to vector<2x8xf32>
    %16 = arith.select %14, %6, %15 : vector<2x8xi1>, vector<2x8xf32>
    %cst_10 = arith.constant 0.000000e+00 : f32
    %17 = vector.broadcast %cst_10 : f32 to vector<2x8xf32>
    %18 = arith.select %14, %5, %17 : vector<2x8xi1>, vector<2x8xf32>
    %cst_11 = arith.constant 5.000000e-01 : f32
    %19 = vector.broadcast %cst_11 : f32 to vector<2x8xf32>
    %20 = arith.select %14, %4, %19 : vector<2x8xi1>, vector<2x8xf32>
    %21 = math.log %20 : vector<2x8xf32>
    %cst_12 = arith.constant -1.000000e+02 : f32
    %22 = vector.broadcast %cst_12 : f32 to vector<2x8xf32>
    %23 = arith.maximumf %21, %22 : vector<2x8xf32>
    %cst_13 = arith.constant 1.000000e+00 : f32
    %24 = vector.broadcast %cst_13 : f32 to vector<2x8xf32>
    %25 = arith.subf %24, %20 : vector<2x8xf32>
    %26 = math.log %25 : vector<2x8xf32>
    %cst_14 = arith.constant -1.000000e+02 : f32
    %27 = vector.broadcast %cst_14 : f32 to vector<2x8xf32>
    %28 = arith.maximumf %26, %27 : vector<2x8xf32>
    %29 = arith.mulf %18, %23 : vector<2x8xf32>
    %cst_15 = arith.constant 1.000000e+00 : f32
    %30 = vector.broadcast %cst_15 : f32 to vector<2x8xf32>
    %31 = arith.subf %30, %18 : vector<2x8xf32>
    %32 = arith.mulf %31, %28 : vector<2x8xf32>
    %33 = arith.addf %29, %32 : vector<2x8xf32>
    %cst_16 = arith.constant 0.000000e+00 : f32
    %34 = vector.broadcast %cst_16 : f32 to vector<2x8xf32>
    %35 = arith.subf %34, %33 : vector<2x8xf32>
    %c1_i32_17 = arith.constant 1 : i32
    %36 = tpu.dynamic_rotate %0 by %c1_i32_17 dim 2 : vector<1x2x8xi32>, i32 -> vector<1x2x8xi32>
    %37 = tpu.iota {dimensions = array<i32: 2>} : vector<1x2x8xi32>
    %c0_i32_18 = arith.constant 0 : i32
    %38 = vector.broadcast %c0_i32_18 : i32 to vector<1x2x8xi32>
    %39 = arith.cmpi eq, %37, %38 : vector<1x2x8xi32>
    %c0_19 = arith.constant 0 : index
    %c0_20 = arith.constant 0 : index
    %c0_21 = arith.constant 0 : index
    %40 = vector.load %arg11[%c0_19, %c0_20, %c0_21] : memref<1x2x1xi32, #tpu.memory_space<vmem>>, vector<1x2x1xi32>
    %41 = vector.shape_cast %40 : vector<1x2x1xi32> to vector<1x2x1xi32>
    %42 = vector.broadcast %41 : vector<1x2x1xi32> to vector<1x2x8xi32>
    %43 = arith.select %39, %42, %36 : vector<1x2x8xi1>, vector<1x2x8xi32>
    %44 = arith.cmpi ne, %0, %43 : vector<1x2x8xi32>
    %45 = vector.shape_cast %44 : vector<1x2x8xi1> to vector<2x8xi1>
    %46 = arith.extui %45 : vector<2x8xi1> to vector<2x8xi32>
    %47 = arith.sitofp %46 : vector<2x8xi32> to vector<2x8xf32>
    %cst_22 = arith.constant 2.000000e+00 : f32
    %48 = vector.broadcast %cst_22 : f32 to vector<2x8xf32>
    %49 = arith.mulf %47, %48 : vector<2x8xf32>
    %cst_23 = arith.constant 1.000000e+00 : f32
    %50 = vector.broadcast %cst_23 : f32 to vector<2x8xf32>
    %51 = arith.addf %50, %49 : vector<2x8xf32>
    %52 = arith.mulf %51, %16 : vector<2x8xf32>
    %53 = arith.mulf %35, %52 : vector<2x8xf32>
    %c0_24 = arith.constant 0 : index
    %c0_25 = arith.constant 0 : index
    %54 = vector.load %arg9[%c0_24, %c0_25] : memref<2x8xf32, #tpu.memory_space<vmem>>, vector<2x8xf32>
    %55 = arith.addf %54, %53 : vector<2x8xf32>
    %c0_26 = arith.constant 0 : index
    %c0_27 = arith.constant 0 : index
    %56 = vector.load %arg9[%c0_26, %c0_27] : memref<2x8xf32, #tpu.memory_space<vmem>>, vector<2x8xf32>
    tpu.vector_store %arg9[%c0_26, %c0_27], %55 {strides = array<i32>} : memref<2x8xf32, #tpu.memory_space<vmem>>, vector<2x8xf32>,
    %c0_28 = arith.constant 0 : index
    %c0_29 = arith.constant 0 : index
    %57 = vector.load %arg10[%c0_28, %c0_29] : memref<2x8xf32, #tpu.memory_space<vmem>>, vector<2x8xf32>
    %58 = arith.addf %57, %52 : vector<2x8xf32>
    %c0_30 = arith.constant 0 : index
    %c0_31 = arith.constant 0 : index
    %59 = vector.load %arg10[%c0_30, %c0_31] : memref<2x8xf32, #tpu.memory_space<vmem>>, vector<2x8xf32>
    tpu.vector_store %arg10[%c0_30, %c0_31], %58 {strides = array<i32>} : memref<2x8xf32, #tpu.memory_space<vmem>>, vector<2x8xf32>,
    %60 = vector.extract_strided_slice %0 {offsets = [0, 0, 7], sizes = [1, 2, 1], strides = [1, 1, 1]} : vector<1x2x8xi32> to vector<1x2x1xi32>
    %c0_32 = arith.constant 0 : index
    %c0_33 = arith.constant 0 : index
    %c0_34 = arith.constant 0 : index
    %61 = vector.load %arg11[%c0_32, %c0_33, %c0_34] : memref<1x2x1xi32, #tpu.memory_space<vmem>>, vector<1x2x1xi32>
    tpu.vector_store %arg11[%c0_32, %c0_33, %c0_34], %60 {strides = array<i32>} : memref<1x2x1xi32, #tpu.memory_space<vmem>>, vector<1x2x1xi32>,
    %c0_i32_35 = arith.constant 0 : i32
    %62 = arith.cmpi eq, %arg1, %c0_i32_35 : i32
    %63 = arith.extui %62 : i1 to i32
    %c0_i32_36 = arith.constant 0 : i32
    %64 = arith.cmpi ne, %63, %c0_i32_36 : i32
    scf.if %64 {
      %c0_37 = arith.constant 0 : index
      %c0_38 = arith.constant 0 : index
      %65 = vector.load %arg9[%c0_37, %c0_38] : memref<2x8xf32, #tpu.memory_space<vmem>>, vector<2x8xf32>
      %66 = vector.shape_cast %65 : vector<2x8xf32> to vector<1x2x8xf32>
      %cst_39 = arith.constant dense<0.000000e+00> : vector<1xf32>
      %67 = vector.multi_reduction <add>, %66, %cst_39 [1, 2] : vector<1x2x8xf32> to vector<1xf32>
      %68 = vector.shape_cast %67 : vector<1xf32> to vector<1x1x1xf32>
      %69 = vector.extract %68[0, 0, 0] : f32 from vector<1x1x1xf32>
      %70 = vector.broadcast %69 : f32 to vector<1x8x128xf32>
      %c0_40 = arith.constant 0 : index
      %c0_41 = arith.constant 0 : index
      %c0_42 = arith.constant 0 : index
      %71 = vector.load %arg7[%c0_40, %c0_41, %c0_42] : memref<1x8x128xf32, #tpu.memory_space<vmem>>, vector<1x8x128xf32>
      tpu.vector_store %arg7[%c0_40, %c0_41, %c0_42], %70 {strides = array<i32>} : memref<1x8x128xf32, #tpu.memory_space<vmem>>, vector<1x8x128xf32>,
      %c0_43 = arith.constant 0 : index
      %c0_44 = arith.constant 0 : index
      %72 = vector.load %arg10[%c0_43, %c0_44] : memref<2x8xf32, #tpu.memory_space<vmem>>, vector<2x8xf32>
      %73 = vector.shape_cast %72 : vector<2x8xf32> to vector<1x2x8xf32>
      %cst_45 = arith.constant dense<0.000000e+00> : vector<1xf32>
      %74 = vector.multi_reduction <add>, %73, %cst_45 [1, 2] : vector<1x2x8xf32> to vector<1xf32>
      %75 = vector.shape_cast %74 : vector<1xf32> to vector<1x1x1xf32>
      %76 = vector.extract %75[0, 0, 0] : f32 from vector<1x1x1xf32>
      %77 = vector.broadcast %76 : f32 to vector<1x8x128xf32>
      %c0_46 = arith.constant 0 : index
      %c0_47 = arith.constant 0 : index
      %c0_48 = arith.constant 0 : index
      %78 = vector.load %arg8[%c0_46, %c0_47, %c0_48] : memref<1x8x128xf32, #tpu.memory_space<vmem>>, vector<1x8x128xf32>
      tpu.vector_store %arg8[%c0_46, %c0_47, %c0_48], %77 {strides = array<i32>} : memref<1x8x128xf32, #tpu.memory_space<vmem>>, vector<1x8x128xf32>,
    } else {
    }
    return
  }
  func.func @transform_0(%arg0: i32, %arg1: i32) -> (i32, i32) {
    %c1_i32 = arith.constant 1 : i32
    %0 = arith.muli %arg0, %c1_i32 : i32
    %1 = arith.addi %0, %arg1 : i32
    %c0_i32 = arith.constant 0 : i32
    %2 = arith.minsi %1, %c0_i32 : i32
    %c0_i32_0 = arith.constant 0 : i32
    %c0_i32_1 = arith.constant 0 : i32
    return %c0_i32_0, %2 : i32, i32
  }
  func.func @transform_1(%arg0: i32, %arg1: i32) -> (i32, i32) {
    %c1_i32 = arith.constant 1 : i32
    %0 = arith.muli %arg0, %c1_i32 : i32
    %1 = arith.addi %0, %arg1 : i32
    %c0_i32 = arith.constant 0 : i32
    %2 = arith.minsi %1, %c0_i32 : i32
    %c0_i32_0 = arith.constant 0 : i32
    %c0_i32_1 = arith.constant 0 : i32
    return %c0_i32_0, %2 : i32, i32
  }
  func.func @transform_2(%arg0: i32, %arg1: i32) -> (i32, i32) {
    %c1_i32 = arith.constant 1 : i32
    %0 = arith.muli %arg0, %c1_i32 : i32
    %1 = arith.addi %0, %arg1 : i32
    %c0_i32 = arith.constant 0 : i32
    %2 = arith.minsi %1, %c0_i32 : i32
    %c0_i32_0 = arith.constant 0 : i32
    %c0_i32_1 = arith.constant 0 : i32
    return %c0_i32_0, %2 : i32, i32
  }
  func.func @transform_3(%arg0: i32, %arg1: i32) -> (i32, i32, i32) {
    %c1_i32 = arith.constant 1 : i32
    %0 = arith.muli %arg0, %c1_i32 : i32
    %1 = arith.addi %0, %arg1 : i32
    %c0_i32 = arith.constant 0 : i32
    %2 = arith.minsi %1, %c0_i32 : i32
    %c0_i32_0 = arith.constant 0 : i32
    %c0_i32_1 = arith.constant 0 : i32
    %c0_i32_2 = arith.constant 0 : i32
    return %c0_i32_0, %c0_i32_1, %2 : i32, i32, i32
  }
  func.func @transform_4(%arg0: i32, %arg1: i32) -> (i32, i32, i32) {
    %c0_i32 = arith.constant 0 : i32
    %c0_i32_0 = arith.constant 0 : i32
    %c0_i32_1 = arith.constant 0 : i32
    return %arg0, %c0_i32, %c0_i32_0 : i32, i32, i32
  }
  func.func @transform_5(%arg0: i32, %arg1: i32) -> (i32, i32, i32) {
    %c0_i32 = arith.constant 0 : i32
    %c0_i32_0 = arith.constant 0 : i32
    %c0_i32_1 = arith.constant 0 : i32
    return %arg0, %c0_i32, %c0_i32_0 : i32, i32, i32
  }
  func.func @transform_6(%arg0: i32, %arg1: i32) -> (i32, i32, i32) {
    %c0_i32 = arith.constant 0 : i32
    %c0_i32_0 = arith.constant 0 : i32
    %c0_i32_1 = arith.constant 0 : i32
    return %arg0, %c0_i32, %c0_i32_0 : i32, i32, i32
  }
}

</mosaic_0001>

<bundles_post_ra>
// kernel: tpu_custom_call.1
= control target key start
LH: loop header
LB: loop body
LE: loop exit
PB: predicated region body
PF: predicated region fallthrough
CT: control target
= control target key end

     0   :  { %12 = vsyncpa [#allocation6], 0  ;;  %vm141_vm0 = vcmask 1024   ;;  %s347_s23 = smov 8   ;;  %v348_v1 = vmov 0   ;;  %s454_s0 = inlined_call_operand.vmem [shape: f32[2,8], index: 0, kind: input, shape index: {}]   ;;  %s455_s1 = inlined_call_operand.vmem [shape: f32[2,8], index: 1, kind: input, shape index: {}]   ;;  %s456_s2 = inlined_call_operand.vmem [shape: f32[2,8], index: 2, kind: input, shape index: {}]   ;;  %s457_s3 = inlined_call_operand.vmem [shape: s32[1,2,8], index: 3, kind: input, shape index: {}]   ;;  %s458_s4 = inlined_call_operand.vmem [shape: s32[1,2,1], index: 4, kind: input, shape index: {}]   ;;  %s459_s5 = inlined_call_operand.hbm [shape: f32[1,8,128], index: 5, kind: output, shape index: {0}]   ;;  %s460_s6 = inlined_call_operand.hbm [shape: f32[1,8,128], index: 6, kind: output, shape index: {1}]  }
   0x1   :  { %v391_v0 = vld [vmem:[%s457_s3] sm:$0x3]  ;;  %293 = vset.pattern.permute.xlu1 %v348_v1 }
   0x2   :  { %169 = vrot.lane.b32.xlu0 %v391_v0, %s347_s23  ;;  %v140_v2 = vld [vmem:[%s458_s4] sm:$0x3] }
   0x3   :  { %13 = vsyncpa [#allocation8], 0  ;;  %142 = vst.msk [vmem:[#allocation4] sm:$0x3] %vm141_vm0, %v140_v2  ;;  %294 = vset.pattern.permute.xlu0 %v348_v1  ;;  %vm137_vm1 = vcmask 58368   ;;  %v349_v4 = vmov 0.0   ;;  %v148_v9 = vlaneseq }
   0x4   :  { %138 = vst.msk [vmem:[#allocation2] sm:$0x3] %vm137_vm1, %v349_v4  ;;  %139 = vst.msk [vmem:[#allocation3] sm:$0x3] %vm137_vm1, %v349_v4  ;;  %vm168_vm2 = vcmask 1047616   ;;  %s350_s3 = smov 121  }
   0x5   :  { %v149_v10 = vand.u32 127, %v148_v9  ;;  %v143_v11 = vld [vmem:[%s454_s0] sm:$0x3]  ;;  %s352_s30 = smov [#allocation7]  }
   0x6   :  { %v144_v16 = vld [vmem:[%s455_s1] sm:$0x3]  ;;  %s351_s1 = smov [#allocation5]   ;;  %s246_s7 = sshll.u32 %s352_s30, 4  ;;  %s423_s7 = int_to_ptr.vmem [resolvable:$true] %s246_s7 }
   0x7   :  { %vm152_vm3 = vcmp.lt.s32.totalorder %v149_v10, 8  ;;  %vm175_vm4 = vcmp.eq.s32.totalorder %v149_v10, 0  ;;  %v145_v28 = vld [vmem:[%s456_s2] sm:$0x3]  ;;  %s236_s2 = sshll.u32 %s351_s1, 4  ;;  %s237_s2 = int_to_ptr.vmem [resolvable:$true] %s236_s2 }
   0x8   :  { %v155_v12 = vsel %vm152_vm3, %v143_v11, 0.5  ;;  %v154_v19 = vsel %vm152_vm3, %v144_v16, 0.0  ;;  %v153_v32 = vsel %vm152_vm3, %v145_v28, 0.0  ;;  %s299_s10 = scalar_lea.vmem %s237_s2, 128  ;;  %p304_p1 = scmp.lt.s32.totalorder %s237_s2, %s237_s2 }
   0x9   :  { %v159_v13 = vsub.f32 1.0, %v155_v12  ;;  %295 = vlog2.f32 %v155_v12  ;;  %v164_v23 = vsub.f32 1.0, %v154_v19  ;;  %p300_p0 = scmp.ne.s32.totalorder %s237_s2, %s299_s10  ;;  %p305_p2 = scmp.lt.s32.totalorder %s299_s10, %s299_s10 }
   0xa   :  { %v176_v3 = vld [vmem:[#allocation4] sm:$0x3] }
   0xb   :  { %178 = vperm.xlu1 %293, %v176_v3   ;;  %297 = vlog2.f32 %v159_v13  ;;  %v194_v35 = vld [vmem:[#allocation3] sm:$0x3]  ;;  %v190_v37 = vld [vmem:[#allocation2] sm:$0x3]  ;;  %p306_p3 = por %p305_p2, %p304_p1 }
   0xd   :  { %p307_p4 = pnand %p306_p3, %p300_p0 }
  0x13   :  { %v296_v14 = vpop.eup %295 }
  0x14   :  { %v157_v17 = vmul.f32 0.6931472, %v296_v14 }
  0x15   :  { %v298_v15 = vpop.eup %297 }
  0x16   :  { %v161_v18 = vmul.f32 0.6931472, %v298_v15  ;;  %v158_v21 = vmax.f32 %v157_v17, -100.0 }
  0x18   :  { %v162_v22 = vmax.f32 %v161_v18, -100.0  ;;  %v163_v24 = vmul.f32 %v158_v21, %v154_v19 }
  0x1a   :  { %v165_v25 = vmul.f32 %v164_v23, %v162_v22 }
  0x1c   :  { %v166_v29 = vadd.f32 %v165_v25, %v163_v24 }
  0x1e   :  { %v167_v33 = vsub.f32 0.0, %v166_v29 }
  0x74   :  { %v170_v5 = vpop.permute.xlu0 %169 }
  0x75   :  { %v171_v6 = vsel %vm168_vm2, %v170_v5, %v391_v0 }
  0x76   :  { %172 = vrot.lane.b32.xlu0 %v171_v6, %s347_s23 }
  0x8a   :  { %v179_v20 = vpop.permute.xlu1 %178 }
  0xe8   :  { %v173_v7 = vpop.permute.xlu0 %172 }
  0xe9   :  { %v174_v8 = vsel %vm168_vm2, %v173_v7, %v391_v0 }
  0xea   :  { %180 = vrot.lane.b32.xlu1 %v174_v8, %s350_s3 }
 0x15c   :  { %v181_v26 = vpop.permute.xlu1 %180 }
 0x15d   :  { %v182_v27 = vsel %vm175_vm4, %v179_v20, %v181_v26 }
 0x15e   :  { %vm183_vm5 = vcmp.ne.s32.totalorder %v391_v0, %v182_v27 }
 0x15f   :  { %v282_v30 = vsel %vm183_vm5, 1.0, %v349_v4 }
 0x160   :  { %v186_v31 = vmul.f32 2.0, %v282_v30 }
 0x162   :  { %v187_v34 = vadd.f32 1.0, %v186_v31 }
 0x164   :  { %v188_v36 = vmul.f32 %v187_v34, %v153_v32 }
 0x166   :  { %v189_v38 = vmul.f32 %v188_v36, %v167_v33  ;;  %v195_v39 = vadd.f32 %v194_v35, %v188_v36 }
 0x168   :  { %v191_v40 = vadd.f32 %v190_v37, %v189_v38  ;;  %196 = vst.msk [vmem:[#allocation3] sm:$0x3] %vm137_vm1, %v195_v39 }
 0x16a   :  { %193 = vst.msk [vmem:[#allocation2] sm:$0x3] %vm137_vm1, %v191_v40 }
 0x16f   :  { %v217_v41 = vld [vmem:[#allocation3] sm:$0x3] }
 0x170   :  { %v218_v42 = vsel %vm137_vm1, %v217_v41, 0.0 }
 0x171   :  { %219 = vadd.xlane.f32.xlu1 %v218_v42  ;;  %v204_v43 = vld [vmem:[#allocation2] sm:$0x3] }
 0x172   :  { %v205_v44 = vsel %vm137_vm1, %v204_v43, 0.0 }
 0x173   :  { %206 = vadd.xlane.f32.xlu0 %v205_v44 }
 0x189   :  { %197 = vrot.lane.b32.xlu0 %v391_v0, %s350_s3 }
 0x1fe   :  { %v220_v45 = vpop.xlane.xlu1 %219 }
 0x1ff   :  { %v221_v46 = vrot.slane %v220_v45, 4 }
 0x200   :  { %v207_v47 = vpop.xlane.xlu0 %206 }
 0x201   :  { %v222_v48 = vadd.f32 %v221_v46, %v220_v45  ;;  %v208_v49 = vrot.slane %v207_v47, 4 }
 0x203   :  { %v223_v50 = vrot.slane %v222_v48, 2  ;;  %v209_v51 = vadd.f32 %v208_v49, %v207_v47 }
 0x204   :  { %v198_v52 = vpop.permute.xlu0 %197 }
 0x205   :  { %v224_v53 = vadd.f32 %v223_v50, %v222_v48  ;;  %v210_v54 = vrot.slane %v209_v51, 2  ;;  %200 = vst.msk [vmem:[#allocation4] sm:$0x3] %vm141_vm0, %v198_v52 }
 0x207   :  { %v211_v55 = vadd.f32 %v210_v54, %v209_v51  ;;  %v225_v56 = vrot.slane %v224_v53, 1 }
 0x209   :  { %v212_v57 = vrot.slane %v211_v55, 1  ;;  %v226_v59 = vadd.f32 %v225_v56, %v224_v53 }
 0x20b   :  { %v213_v58 = vadd.f32 %v212_v57, %v211_v55 }
 0x20d   :  { %283 = vpush %v213_v58 }
 0x20e   :  { %285 = vpush %v226_v59 }
 0x23e   :  { %s284_s8 = spop %283 }
 0x23f   :  { %v215_v60 = vstv %s284_s8  ;;  %s286_s9 = spop %285 }
 0x240   :  { %216 = vst [vmem:[#allocation5] sm:$0xff] %v215_v60  ;;  %v228_v61 = vstv %s286_s9 }
 0x241   :  { %229 = vst [vmem:[#allocation7] sm:$0xff] %v228_v61 }
 0x242   :  { %310 = shalt.err (!%p307_p4)
}
 0x243   :  { %s311_s13 = scalar_lea.hbm %s459_s5, 128 }
 0x244   :  { %p312_p5 = scmp.ne.s32.totalorder %s459_s5, %s311_s13  ;;  %p315_p6 = scmp.lt.u32.totalorder %s311_s13, %s459_s5 }
 0x246   :  { %p317_p7 = pnand %p315_p6, %p312_p5 }
 0x248   :  { %320 = shalt.err (!%p317_p7)
}
 0x249   :  { %239 = dma.vmem_to_hbm [thread:$0]  %s237_s2, 128, %s459_s5, [#allocation6]  }
 0x24a   :  { %s321_s20 = scalar_lea.vmem %s423_s7, 128  ;;  %p326_p9 = scmp.lt.s32.totalorder %s423_s7, %s423_s7 }
 0x24b   :  { %p322_p8 = scmp.ne.s32.totalorder %s423_s7, %s321_s20  ;;  %p327_p10 = scmp.lt.s32.totalorder %s321_s20, %s321_s20 }
 0x24d   :  { %p328_p11 = por %p327_p10, %p326_p9 }
 0x24f   :  { %p329_p12 = pnand %p328_p11, %p322_p8 }
 0x251   :  { %332 = shalt.err (!%p329_p12)
}
 0x252   :  { %s333_s23 = scalar_lea.hbm %s460_s6, 128 }
 0x253   :  { %p334_p13 = scmp.ne.s32.totalorder %s460_s6, %s333_s23  ;;  %p337_p0 = scmp.lt.u32.totalorder %s333_s23, %s460_s6 }
 0x255   :  { %p339_p1 = pnand %p337_p0, %p334_p13 }
 0x257   :  { %342 = shalt.err (!%p339_p1)
}
 0x258   :  { %249 = dma.vmem_to_hbm [thread:$0]  %s423_s7, 128, %s460_s6, [#allocation8]  }
 0x259   :  { %343 = dma.done.wait [#allocation6], 128  }
 0x25a   :  { %344 = vsyncadd [#allocation6], 4294967168 }
 0x25b   :  { %345 = dma.done.wait [#allocation8], 128  }
 0x25c   :  { %346 = vsyncadd [#allocation8], 4294967168 }
 0x25d   :  { %256 = vsyncpa [#allocation6], 1 }
 0x25e   :  { %257 = vsyncpa [#allocation8], 1 }

</bundles_post_ra>
